<compile_context>
chip_gen: v7x
topology: tpu7x:2x2x1
jax: 0.10.0
libtpu: 0.0.40
codegen_flags: <defaults>
</compile_context>

<pallas_src>
import functools

import numpy as np
import jax
import jax.numpy as jnp
from jax import lax
from jax.experimental import pallas as pl
from jax.experimental.pallas import tpu as pltpu

_BN_EPS = 1e-5


def _round_up(v, m):
    return ((v + m - 1) // m) * m


def _vmem_capacity_bytes():
    """Per-core VMEM capacity (trace-time query, conservative fallback)."""
    try:
        info = pltpu.get_tpu_info()
        cap = getattr(info, "vmem_capacity_bytes", None)
        if cap:
            return int(cap)
    except Exception:
        pass
    return 64 * 1024 * 1024      # v7x per-TensorCore size (smallest current gen)


def _bottleneck_kernel(x_ref, w1_ref, pk_ref, w3_ref, b3_ref, o_ref, *scratch,
                       seq_len, tl_in, tl_out, stride, n_lt, nb, with_skip,
                       manual_dma):
    """One (batch-block, L-tile) grid step.

    x_ref  : padded input.  manual_dma=False -> VMEM block (nb, Cin, TLw);
             manual_dma=True -> raw HBM ref (N, Cin, Lp), windows DMA'd here.
    w1_ref : (Ct, Cin)   conv1 weight, bn1 scale folded
    pk_ref : (Ct, 5)     [w2_k0, w2_k1, w2_k2, b1, b2] (bn2 scale folded)
    w3_ref : (Cout, Ct)  conv3 weight, bn3 scale folded
    b3_ref : (Cout, 1)
    o_ref  : (nb, Cout, TLout) lane-dense NCL output tile
    """
    lt = pl.program_id(1)
    tlw = tl_in + 2

    if manual_dma:
        buf, sem = scratch
        row0 = pl.program_id(0) * nb

        def window_copy(lt_idx):
            slot = lt_idx % 2
            col0 = lt_idx * tl_in
            return pltpu.make_async_copy(
                x_ref.at[pl.ds(row0, nb), :, pl.ds(col0, tlw)],
                buf.at[slot], sem.at[slot])

        @pl.when(lt == 0)
        def _():
            window_copy(lt).start()

        # Prefetch the next L-tile window of this batch row (L axis is
        # "arbitrary", i.e. sequential per core, so this never dangles).
        @pl.when(lt + 1 < n_lt)
        def _():
            window_copy(lt + 1).start()

        window_copy(lt).wait()
        xw = buf[lt % 2]                   # (nb, Cin, TLw)
    else:
        xw = x_ref[...]                    # (nb, Cin, TLw), BlockSpec-pipelined

    w1 = w1_ref[...]
    w3 = w3_ref[...]
    pk = pk_ref[...]
    b3 = b3_ref[...]

    # conv2's zero padding: padded-coordinate column 0 and columns > L must be
    # exactly zero after bn1/ReLU6 (interior tiles: all-true, cheap VPU filler).
    g = lt * tl_in + lax.broadcasted_iota(jnp.int32, (1, tlw), 1)
    valid = (g >= 1) & (g <= seq_len)

    for b in range(nb):
        x = xw[b]                                            # (Cin, TLw)

        # ---- conv1 (1x1) + folded bn1 + ReLU6 ------------------------------
        # TODO(synk): for production channel counts pad Ct/Cin/Cout toward the
        # MXU width; for very small channels a VPU broadcast-FMA path would
        # avoid the MXU push/pop latency.
        h = jnp.dot(w1, x.astype(w1.dtype),
                    preferred_element_type=jnp.float32)      # (Ct, TLw) f32
        h = jnp.clip(h + pk[:, 3:4], 0.0, 6.0)
        h = jnp.where(valid, h, 0.0)

        # ---- depthwise conv (k=3, pad=1) + folded bn2 + ReLU6 --------------
        # Full-width FMA, then one ::stride subsample (single lane gather).
        # TODO(synk): if the bundle dump shows materialized copies for the
        # offset-1/2 slices, switch them to pltpu.roll + boundary mask.
        t0 = h[:, 0:tl_in]
        t1 = h[:, 1:1 + tl_in]
        t2 = h[:, 2:2 + tl_in]
        dw = pk[:, 0:1] * t0 + pk[:, 1:2] * t1 + pk[:, 2:3] * t2
        dw = jnp.clip(dw + pk[:, 4:5], 0.0, 6.0)             # (Ct, TLin)
        if stride > 1:
            dw = dw[:, ::stride]                             # (Ct, TLout)

        # ---- conv3 (1x1) + folded bn3 (+ residual, kept in f32) ------------
        out = jnp.dot(w3, dw.astype(w3.dtype),
                      preferred_element_type=jnp.float32)    # (Cout, TLout)
        out = out + b3
        if with_skip:
            out = out + x[:, 1:1 + tl_out].astype(jnp.float32)
        o_ref[b] = out.astype(o_ref.dtype)


def bottleneck_pallas(x_ncl, params, *, stride=1, tile_lout=2048,
                      batch_block=None, use_bf16=False, out_dtype=None):
    """x_ncl: (N, Cin, L) float32, PyTorch Conv1d layout.  Returns (N, Cout, Lout)."""
    N, Cin, L = x_ncl.shape
    w1, pk, w3, b3 = params
    Ct = w1.shape[0]
    Cout = w3.shape[0]
    Lout = (L - 1) // stride + 1
    with_skip = (stride == 1) and (Cin == Cout)
    out_dtype = jnp.float32 if out_dtype is None else out_dtype

    in_isize = np.dtype(x_ncl.dtype).itemsize
    out_isize = np.dtype(out_dtype).itemsize

    # ---- per-generation VMEM budget ----------------------------------------
    vmem_cap = _vmem_capacity_bytes()
    vmem_limit = max(32 << 20, min((vmem_cap * 3) // 4, 96 << 20))
    budget = int(vmem_limit * 0.6)

    cin8, ct8, cout8 = _round_up(Cin, 8), _round_up(Ct, 8), _round_up(Cout, 8)

    def step_bytes(tl, nb_):
        tli = tl * stride
        twl = _round_up(tli + 2, 128)
        tll = _round_up(tl, 128)
        b = 2 * nb_ * cin8 * twl * in_isize            # input window, dbl-buffer
        b += 2 * nb_ * cout8 * tll * out_isize         # pipelined output blocks
        b += 4 * ct8 * twl * 4                         # h / taps / dw temporaries
        b += (ct8 * _round_up(Cin, 128) + cout8 * _round_up(Ct, 128)
              + ct8 * 128 + cout8 * 128) * 4           # resident weights
        return b

    # ---- L tiling (ragged handled by padding the output and slicing) -------
    t_cap = max(128, (min(tile_lout, _round_up(Lout, 128)) // 128) * 128)
    if Lout <= t_cap and step_bytes(Lout, 1) <= budget:
        tl_out, n_lt = Lout, 1
    else:
        tl_out = t_cap
        while tl_out > 128 and step_bytes(tl_out, 1) > budget:
            tl_out -= 128
        n_lt = -(-Lout // tl_out)
        if n_lt == 1:
            tl_out = Lout
    Lout_pad = n_lt * tl_out
    tl_in = tl_out * stride
    tlw = tl_in + 2
    manual_dma = n_lt > 1

    # ---- batch folding (amortize per-step overhead, keep >=2 parallel steps)
    if batch_block is not None:
        assert N % batch_block == 0, (N, batch_block)
        nb = batch_block
    else:
        nb = 1
        for cand in (8, 4, 2):
            if (cand <= N and N % cand == 0 and N // cand >= 2
                    and step_bytes(tl_out, cand) <= budget):
                nb = cand
                break
    # TODO(synk): when N == 1 the grid has a single "parallel" step and v7x's
    # second TensorCore idles; would need halo-aware parallel L tiling.

    # ---- one-time input pad: 1 left conv-pad column + right alignment pad --
    rpad = n_lt * tl_in + 1 - L                         # >= 1 by construction
    xp = jnp.pad(x_ncl, ((0, 0), (0, 0), (1, rpad)))    # (N, Cin, n_lt*TLin + 2)

    cdt = jnp.bfloat16 if use_bf16 else jnp.float32
    w1_c = w1.astype(cdt)
    w3_c = w3.astype(cdt)

    kernel = functools.partial(
        _bottleneck_kernel, seq_len=L, tl_in=tl_in, tl_out=tl_out,
        stride=stride, n_lt=n_lt, nb=nb, with_skip=with_skip,
        manual_dma=manual_dma)

    if manual_dma:
        x_spec = pl.BlockSpec(memory_space=pl.ANY)      # raw HBM ref, halo DMA
        scratch_shapes = [pltpu.VMEM((2, nb, Cin, tlw), xp.dtype),
                          pltpu.SemaphoreType.DMA((2,))]
    else:
        x_spec = pl.BlockSpec((nb, Cin, tlw), lambda n, l: (n, 0, 0))
        scratch_shapes = []

    out = pl.pallas_call(
        kernel,
        out_shape=jax.ShapeDtypeStruct((N, Cout, Lout_pad), out_dtype),
        grid=(N // nb, n_lt),
        in_specs=[
            x_spec,
            pl.BlockSpec((Ct, Cin), lambda n, l: (0, 0)),
            pl.BlockSpec((Ct, 5), lambda n, l: (0, 0)),
            pl.BlockSpec((Cout, Ct), lambda n, l: (0, 0)),
            pl.BlockSpec((Cout, 1), lambda n, l: (0, 0)),
        ],
        out_specs=pl.BlockSpec((nb, Cout, tl_out), lambda n, l: (n, 0, l)),
        scratch_shapes=scratch_shapes,
        compiler_params=pltpu.CompilerParams(
            dimension_semantics=("parallel", "arbitrary"),
            vmem_limit_bytes=vmem_limit),
    )(xp, w1_c, pk, w3_c, b3)

    if Lout_pad != Lout:
        out = out[:, :, :Lout]
    return out


# ---------------------------------------------------------------------------
# Deterministic parameter construction (matches nn.Module __init__ shapes),
# with inference-BN scales folded into the kernel-side weights.
# ---------------------------------------------------------------------------
def make_params(key, inplanes, outplanes, t):
    Ct = inplanes * t
    ks = jax.random.split(key, 15)

    def bn_params(kg, kb, km, kv, c):
        gamma = 1.0 + 0.1 * jax.random.normal(kg, (c,), jnp.float32)
        beta = 0.1 * jax.random.normal(kb, (c,), jnp.float32)
        mean = 0.1 * jax.random.normal(km, (c,), jnp.float32)
        var = jnp.abs(jax.random.normal(kv, (c,), jnp.float32)) + 0.5
        return gamma, beta, mean, var

    # torch-layout conv weights: conv1 (Ct,Cin,1), conv2 (Ct,1,3), conv3 (Cout,Ct,1)
    w1_t = 0.1 * jax.random.normal(ks[0], (Ct, inplanes, 1), jnp.float32)
    w2_t = 0.1 * jax.random.normal(ks[1], (Ct, 1, 3), jnp.float32)
    w3_t = 0.1 * jax.random.normal(ks[2], (outplanes, Ct, 1), jnp.float32)
    bn1 = bn_params(ks[3], ks[4], ks[5], ks[6], Ct)
    bn2 = bn_params(ks[7], ks[8], ks[9], ks[10], Ct)
    bn3 = bn_params(ks[11], ks[12], ks[13], ks[14], outplanes)

    def fold(gamma, beta, mean, var):
        s = gamma / jnp.sqrt(var + _BN_EPS)
        return s, beta - mean * s

    s1, b1 = fold(*bn1)
    s2, b2 = fold(*bn2)
    s3, b3 = fold(*bn3)

    w1f = w1_t[:, :, 0] * s1[:, None]                               # (Ct, Cin)
    w2f = w2_t[:, 0, :] * s2[:, None]                               # (Ct, 3)
    w3f = w3_t[:, :, 0] * s3[:, None]                               # (Cout, Ct)
    pk = jnp.concatenate([w2f, b1[:, None], b2[:, None]], axis=1)   # (Ct, 5)

    kernel_params = (w1f, pk, w3f, b3[:, None])
    torch_params = (w1_t, w2_t, w3_t, bn1, bn2, bn3)
    return kernel_params, torch_params


# ---------------------------------------------------------------------------
# Pure-JAX reference (mirrors the PyTorch forward, eval-mode BN).
# ---------------------------------------------------------------------------
def reference_forward(x_ncl, torch_params, *, stride=1):
    w1_t, w2_t, w3_t, bn1, bn2, bn3 = torch_params

    def conv1d(x, w, s, pad, groups):
        return lax.conv_general_dilated(
            x, w, window_strides=(s,), padding=[(pad, pad)],
            dimension_numbers=("NCH", "OIH", "NCH"),
            feature_group_count=groups)

    def bn(x, p):
        g, b, m, v = p
        return (x - m[None, :, None]) / jnp.sqrt(v[None, :, None] + _BN_EPS) \
            * g[None, :, None] + b[None, :, None]

    relu6 = lambda z: jnp.clip(z, 0.0, 6.0)
    Ct = w1_t.shape[0]
    out = relu6(bn(conv1d(x_ncl, w1_t, 1, 0, 1), bn1))
    out = relu6(bn(conv1d(out, w2_t, stride, 1, Ct), bn2))
    out = bn(conv1d(out, w3_t, 1, 0, 1), bn3)
    if stride == 1 and x_ncl.shape[1] == out.shape[1]:
        out = out + x_ncl
    return out


if __name__ == "__main__":
    key = jax.random.PRNGKey(0)
    configs = [
        # (inplanes, outplanes, t, stride, N, L, tile_lout)
        (4, 4, 4, 1, 2, 256, 2048),   # skip connection, single tile (BlockSpec path)
        (4, 8, 6, 2, 2, 256, 2048),   # stride 2, channel expansion, single tile
        (4, 4, 4, 1, 2, 384, 128),    # 3 L tiles -> manual halo-DMA path
        (4, 4, 4, 1, 2, 300, 128),    # ragged Lout (padded output + slice)
        (4, 8, 6, 2, 2, 512, 128),    # stride 2, 2 L tiles, manual halo-DMA
        (8, 8, 2, 1, 8, 256, 2048),   # batch folding (4 samples per grid step)
    ]
    for (cin, cout, t, stride, n, length, tile) in configs:
        key, kx, kp = jax.random.split(key, 3)
        x = jax.random.normal(kx, (n, cin, length), jnp.float32)   # NCL like torch
        kparams, tparams = make_params(kp, cin, cout, t)

        out = jax.block_until_ready(
            bottleneck_pallas(x, kparams, stride=stride, tile_lout=tile))
        ref = jax.block_until_ready(reference_forward(x, tparams, stride=stride))
        assert out.shape == ref.shape, (out.shape, ref.shape)
        err = float(jnp.max(jnp.abs(out - ref)))
        assert jnp.allclose(out, ref, atol=2e-4, rtol=2e-4), err

    # bf16 matmul operands + bf16 output; residual add and accumulation in f32.
    cin, cout, t, stride, n, length, tile = configs[0]
    key, kx, kp = jax.random.split(key, 3)
    x = jax.random.normal(kx, (n, cin, length), jnp.float32)
    kparams, tparams = make_params(kp, cin, cout, t)
    out_bf = jax.block_until_ready(
        bottleneck_pallas(x, kparams, stride=stride, tile_lout=tile,
                          use_bf16=True, out_dtype=jnp.bfloat16))
    ref = reference_forward(x, tparams, stride=stride)
    assert out_bf.shape == ref.shape
    err_bf = float(jnp.max(jnp.abs(out_bf.astype(jnp.float32) - ref)))
    assert jnp.allclose(out_bf.astype(jnp.float32), ref, atol=1e-1, rtol=1e-1), err_bf

    print("KERNEL_OK")
</pallas_src>

<mosaic_0001>
module attributes {stable_mosaic.version = 11 : i64} {
  func.func @_bottleneck_kernel(%arg0: i32, %arg1: i32, %arg2: memref<1x4x258xf32, #tpu.memory_space<vmem>>, %arg3: memref<16x4xf32, #tpu.memory_space<vmem>>, %arg4: memref<16x5xf32, #tpu.memory_space<vmem>>, %arg5: memref<4x16xf32, #tpu.memory_space<vmem>>, %arg6: memref<4x1xf32, #tpu.memory_space<vmem>>, %arg7: memref<1x4x256xf32, #tpu.memory_space<vmem>>) attributes {dimension_semantics = [#tpu.dimension_semantics<parallel>, #tpu.dimension_semantics<arbitrary>], iteration_bounds = array<i64: 2, 1>, scalar_prefetch = 0 : i64, scratch_operands = 0 : i64, tpu.core_type = #tpu.core_type<tc>, window_params = [{transform_indices = @transform_0, window_bounds = array<i64: 1, 4, 258>}, {pipeline_mode = #tpu.pipeline_mode<synchronous>, transform_indices = @transform_1, window_bounds = array<i64: 16, 4>}, {pipeline_mode = #tpu.pipeline_mode<synchronous>, transform_indices = @transform_2, window_bounds = array<i64: 16, 5>}, {pipeline_mode = #tpu.pipeline_mode<synchronous>, transform_indices = @transform_3, window_bounds = array<i64: 4, 16>}, {pipeline_mode = #tpu.pipeline_mode<synchronous>, transform_indices = @transform_4, window_bounds = array<i64: 4, 1>}, {transform_indices = @transform_5, window_bounds = array<i64: 1, 4, 256>}]} {
    %c0 = arith.constant 0 : index
    %c0_0 = arith.constant 0 : index
    %c0_1 = arith.constant 0 : index
    %0 = vector.load %arg2[%c0, %c0_0, %c0_1] : memref<1x4x258xf32, #tpu.memory_space<vmem>>, vector<1x4x258xf32>
    %c0_2 = arith.constant 0 : index
    %c0_3 = arith.constant 0 : index
    %1 = vector.load %arg3[%c0_2, %c0_3] : memref<16x4xf32, #tpu.memory_space<vmem>>, vector<16x4xf32>
    %c0_4 = arith.constant 0 : index
    %c0_5 = arith.constant 0 : index
    %2 = vector.load %arg5[%c0_4, %c0_5] : memref<4x16xf32, #tpu.memory_space<vmem>>, vector<4x16xf32>
    %c0_6 = arith.constant 0 : index
    %c0_7 = arith.constant 0 : index
    %3 = vector.load %arg4[%c0_6, %c0_7] : memref<16x5xf32, #tpu.memory_space<vmem>>, vector<16x5xf32>
    %c0_8 = arith.constant 0 : index
    %c0_9 = arith.constant 0 : index
    %4 = vector.load %arg6[%c0_8, %c0_9] : memref<4x1xf32, #tpu.memory_space<vmem>>, vector<4x1xf32>
    %c256_i32 = arith.constant 256 : i32
    %5 = arith.muli %arg1, %c256_i32 : i32
    %6 = tpu.iota {dimensions = array<i32: 1>} : vector<1x258xi32>
    %7 = vector.broadcast %5 : i32 to vector<1x258xi32>
    %8 = arith.addi %7, %6 : vector<1x258xi32>
    %c1_i32 = arith.constant 1 : i32
    %9 = vector.broadcast %c1_i32 : i32 to vector<1x258xi32>
    %10 = arith.cmpi sge, %8, %9 : vector<1x258xi32>
    %c256_i32_10 = arith.constant 256 : i32
    %11 = vector.broadcast %c256_i32_10 : i32 to vector<1x258xi32>
    %12 = arith.cmpi sle, %8, %11 : vector<1x258xi32>
    %13 = arith.andi %10, %12 : vector<1x258xi1>
    %14 = vector.shape_cast %0 : vector<1x4x258xf32> to vector<4x258xf32>
    %cst = arith.constant dense<0.000000e+00> : vector<16x258xf32>
    %15 = tpu.matmul %1, %14, %cst {dimension_numbers = #tpu.dot_dimension_numbers<[1], [0], [0], [1], [0, 0, 1, 1], [], []>} : vector<16x4xf32>, vector<4x258xf32>, vector<16x258xf32> -> vector<16x258xf32>
    %16 = vector.extract_strided_slice %3 {offsets = [0, 3], sizes = [16, 1], strides = [1, 1]} : vector<16x5xf32> to vector<16x1xf32>
    %17 = vector.broadcast %16 : vector<16x1xf32> to vector<16x258xf32>
    %18 = arith.addf %15, %17 : vector<16x258xf32>
    %cst_11 = arith.constant 0.000000e+00 : f32
    %cst_12 = arith.constant 6.000000e+00 : f32
    %19 = vector.broadcast %cst_11 : f32 to vector<16x258xf32>
    %20 = arith.maximumf %19, %18 : vector<16x258xf32>
    %21 = vector.broadcast %cst_12 : f32 to vector<16x258xf32>
    %22 = arith.minimumf %21, %20 : vector<16x258xf32>
    %cst_13 = arith.constant 0.000000e+00 : f32
    %23 = vector.shape_cast %13 : vector<1x258xi1> to vector<1x258xi1>
    %24 = vector.broadcast %23 : vector<1x258xi1> to vector<16x258xi1>
    %25 = vector.broadcast %cst_13 : f32 to vector<16x258xf32>
    %26 = arith.select %24, %22, %25 : vector<16x258xi1>, vector<16x258xf32>
    %27 = vector.extract_strided_slice %26 {offsets = [0, 0], sizes = [16, 256], strides = [1, 1]} : vector<16x258xf32> to vector<16x256xf32>
    %28 = vector.extract_strided_slice %26 {offsets = [0, 1], sizes = [16, 256], strides = [1, 1]} : vector<16x258xf32> to vector<16x256xf32>
    %29 = vector.extract_strided_slice %26 {offsets = [0, 2], sizes = [16, 256], strides = [1, 1]} : vector<16x258xf32> to vector<16x256xf32>
    %30 = vector.extract_strided_slice %3 {offsets = [0, 0], sizes = [16, 1], strides = [1, 1]} : vector<16x5xf32> to vector<16x1xf32>
    %31 = vector.broadcast %30 : vector<16x1xf32> to vector<16x256xf32>
    %32 = arith.mulf %31, %27 : vector<16x256xf32>
    %33 = vector.extract_strided_slice %3 {offsets = [0, 1], sizes = [16, 1], strides = [1, 1]} : vector<16x5xf32> to vector<16x1xf32>
    %34 = vector.broadcast %33 : vector<16x1xf32> to vector<16x256xf32>
    %35 = arith.mulf %34, %28 : vector<16x256xf32>
    %36 = arith.addf %32, %35 : vector<16x256xf32>
    %37 = vector.extract_strided_slice %3 {offsets = [0, 2], sizes = [16, 1], strides = [1, 1]} : vector<16x5xf32> to vector<16x1xf32>
    %38 = vector.broadcast %37 : vector<16x1xf32> to vector<16x256xf32>
    %39 = arith.mulf %38, %29 : vector<16x256xf32>
    %40 = arith.addf %36, %39 : vector<16x256xf32>
    %41 = vector.extract_strided_slice %3 {offsets = [0, 4], sizes = [16, 1], strides = [1, 1]} : vector<16x5xf32> to vector<16x1xf32>
    %42 = vector.broadcast %41 : vector<16x1xf32> to vector<16x256xf32>
    %43 = arith.addf %40, %42 : vector<16x256xf32>
    %cst_14 = arith.constant 0.000000e+00 : f32
    %cst_15 = arith.constant 6.000000e+00 : f32
    %44 = vector.broadcast %cst_14 : f32 to vector<16x256xf32>
    %45 = arith.maximumf %44, %43 : vector<16x256xf32>
    %46 = vector.broadcast %cst_15 : f32 to vector<16x256xf32>
    %47 = arith.minimumf %46, %45 : vector<16x256xf32>
    %cst_16 = arith.constant dense<0.000000e+00> : vector<4x256xf32>
    %48 = tpu.matmul %2, %47, %cst_16 {dimension_numbers = #tpu.dot_dimension_numbers<[1], [0], [0], [1], [0, 0, 1, 1], [], []>} : vector<4x16xf32>, vector<16x256xf32>, vector<4x256xf32> -> vector<4x256xf32>
    %49 = vector.broadcast %4 : vector<4x1xf32> to vector<4x256xf32>
    %50 = arith.addf %48, %49 : vector<4x256xf32>
    %51 = vector.extract_strided_slice %14 {offsets = [0, 1], sizes = [4, 256], strides = [1, 1]} : vector<4x258xf32> to vector<4x256xf32>
    %52 = arith.addf %50, %51 : vector<4x256xf32>
    %c0_17 = arith.constant 0 : index
    %c0_18 = arith.constant 0 : index
    %c0_19 = arith.constant 0 : index
    %53 = vector.load %arg7[%c0_17, %c0_18, %c0_19] : memref<1x4x256xf32, #tpu.memory_space<vmem>>, vector<1x4x256xf32>
    %54 = vector.shape_cast %53 : vector<1x4x256xf32> to vector<4x256xf32>
    %55 = vector.shape_cast %52 : vector<4x256xf32> to vector<1x4x256xf32>
    tpu.vector_store %arg7[%c0_17, %c0_18, %c0_19], %55 {strides = array<i32>} : memref<1x4x256xf32, #tpu.memory_space<vmem>>, vector<1x4x256xf32>,
    return
  }
  func.func @transform_0(%arg0: i32, %arg1: i32) -> (i32, i32, i32) {
    %c0_i32 = arith.constant 0 : i32
    %c0_i32_0 = arith.constant 0 : i32
    %c0_i32_1 = arith.constant 0 : i32
    return %arg0, %c0_i32, %c0_i32_0 : i32, i32, i32
  }
  func.func @transform_1(%arg0: i32, %arg1: i32) -> (i32, i32) {
    %c0_i32 = arith.constant 0 : i32
    %c0_i32_0 = arith.constant 0 : i32
    %c0_i32_1 = arith.constant 0 : i32
    return %c0_i32, %c0_i32_0 : i32, i32
  }
  func.func @transform_2(%arg0: i32, %arg1: i32) -> (i32, i32) {
    %c0_i32 = arith.constant 0 : i32
    %c0_i32_0 = arith.constant 0 : i32
    %c0_i32_1 = arith.constant 0 : i32
    return %c0_i32, %c0_i32_0 : i32, i32
  }
  func.func @transform_3(%arg0: i32, %arg1: i32) -> (i32, i32) {
    %c0_i32 = arith.constant 0 : i32
    %c0_i32_0 = arith.constant 0 : i32
    %c0_i32_1 = arith.constant 0 : i32
    return %c0_i32, %c0_i32_0 : i32, i32
  }
  func.func @transform_4(%arg0: i32, %arg1: i32) -> (i32, i32) {
    %c0_i32 = arith.constant 0 : i32
    %c0_i32_0 = arith.constant 0 : i32
    %c0_i32_1 = arith.constant 0 : i32
    return %c0_i32, %c0_i32_0 : i32, i32
  }
  func.func @transform_5(%arg0: i32, %arg1: i32) -> (i32, i32, i32) {
    %c0_i32 = arith.constant 0 : i32
    %c0_i32_0 = arith.constant 0 : i32
    return %arg0, %c0_i32, %arg1 : i32, i32, i32
  }
}

</mosaic_0001>

<bundles_post_ra>
// kernel: tpu_custom_call.1
= control target key start
LH: loop header
LB: loop body
LE: loop exit
PB: predicated region body
PF: predicated region fallthrough
CT: control target
= control target key end

     0   :  { %10 = vsyncpa [#allocation3], 0  ;;  %s1174_s0 = inlined_call_operand.vmem [shape: f32[2,4,258], index: 0, kind: input, shape index: {}]   ;;  %s1175_s1 = inlined_call_operand.vmem [shape: f32[16,4], index: 1, kind: input, shape index: {}]   ;;  %s1176_s2 = inlined_call_operand.vmem [shape: f32[16,5], index: 2, kind: input, shape index: {}]   ;;  %s1177_s3 = inlined_call_operand.vmem [shape: f32[4,16], index: 3, kind: input, shape index: {}]   ;;  %s1178_s4 = inlined_call_operand.vmem [shape: f32[4,1], index: 4, kind: input, shape index: {}]   ;;  %s1179_s5 = inlined_call_operand.hbm [shape: f32[2,4,256], index: 5, kind: output, shape index: {}]  }
   0x1   :  { %12 = vsyncpa [#allocation3 + $0x1], 0  ;;  %s997_s18 = smov 0   ;;  %s999_s19 = smov 0  }
   0x2   :  { %s1001_s20 = smov 0   ;;  %s1003_s21 = smov 0  }
   0x3   :  { %s1005_s22 = smov 0   ;;  %s1007_s23 = smov 0  }
   0x4 LB: > { %s773_s24 = sadd.s32 4294967295, %s956_s23   ;;  %s774_s25 = sadd.s32 4294967294, %s956_s23   ;;  %s956_s23 = sphi %s1007_s23, %s18_s23   ;;  %s952_s22 = sphi %s1005_s22, %s1186_s22   ;;  %s948_s21 = sphi %s1003_s21, %s1185_s21   ;;  %s944_s20 = sphi %s1001_s20, %s1184_s20   ;;  %s940_s19 = sphi %s999_s19, %s1183_s19   ;;  %s936_s18 = sphi %s997_s18, %s1182_s18  }
   0x5   : > { %s30_s26 = sadd.s32 1, %s952_s22  ;;  %s149_s27 = sadd.s32 1, %s944_s20 }
   0x6   : > { %p32_p0 = scmp.ge.s32.totalorder %s30_s26, 2  ;;  %p159_p1 = scmp.ne.s32.totalorder %s944_s20, %s940_s19 }
   0x7   : > { %p160_p2 = scmp.eq.s32.totalorder %s773_s24, 1  ;;  %p165_p3 = scmp.ne.s32.totalorder %s940_s19, %s936_s18 }
   0x8   : > { %s1188_s26 = smov (%p32_p0, %s30_s26), 0  ;;  %p166_p5 = scmp.eq.s32.totalorder %s774_s25, 1 }
   0x9   : > { %p1037_p4 = por %p160_p2, %p159_p1  ;;  %s144_s29 = ssub.s32 %s952_s22, %s1188_s26 }
   0xa   : > { %p777_p6 = scmp.ge.s32.totalorder %s956_s23, 1  ;;  %p147_p7 = scmp.eq.s32.totalorder %s144_s29, 0 }
   0xb   : > { %p1044_p8 = por %p166_p5, %p165_p3  ;;  %p204_p9 = scmp.lt.s32.totalorder %s956_s23, 3 }
   0xc   : > { %s1050_s6 = scalar_select %p147_p7, %s944_s20, %s149_s27  }
   0xd   : > { %p205_p10 = pnand %p777_p6, %p204_p9 }
   0xe   : > { %p232_p11 = scmp.lt.s32.totalorder (!%p205_p10), %s948_s21, 1  ;;  %v240_v0 = vld [vmem:[%s1175_s1] sm:$0xff] (!%p205_p10)  ;;  %vm277_vm0 = vcmask (!%p205_p10), 31744   ;;  %v958_v1 = vmov (!%p205_p10), 0.0   ;;  %v959_v3 = vmov (!%p205_p10), 3   ;;  %v960_v4 = vmov (!%p205_p10), 1  }
   0xf   : > { %208 = sbr.rel (%p205_p10) target bundleno = 635 (0x27b), region = 40  ;;  %799 = vmatprep.mubr.msk.f32.mxu1 (!%p205_p10), %vm277_vm0, %v240_v0  ;;  %355 = vmatprep.mubr.f32.mxu0 (!%p205_p10), %v958_v1  ;;  %v243_v2 = vld [vmem:[%s1176_s2] sm:$0xff] (!%p205_p10)  ;;  %v244_v5 = vld [vmem:[%s1176_s2 + $0x8] sm:$0xff] (!%p205_p10)  ;;  %vm284_vm1 = vcmask (!%p205_p10), 1043456   ;;  %v961_v10 = vmov (!%p205_p10), 2   ;;  %v962_v11 = vmov (!%p205_p10), 0   ;;  %v247_v13 = vlaneseq (!%p205_p10) }
  0x10   : > { %870 = vset.pattern.permute.xlu0 (!%p205_p10), %v959_v3  ;;  %871 = vset.pattern.permute.xlu1 (!%p205_p10), %v960_v4  ;;  %v241_v8 = vld [vmem:[%s1175_s1 + $0x8] sm:$0xff] (!%p205_p10)  ;;  %v963_v12 = vmov (!%p205_p10), 4   ;;  %s964_s27 = smov (!%p205_p10), 127   ;;  %s965_s29 = smov (!%p205_p10), 126   ;;  %v245_v62 = vld [vmem:[%s1178_s4] sm:$0xf] (!%p205_p10) }
  0x11   : > { %266 = vperm.xlu0 (!%p205_p10), %870, %v243_v2   ;;  %480 = vperm.xlu1 (!%p205_p10), %871, %v243_v2   ;;  %v248_v15 = vand.u32 (!%p205_p10), 127, %v247_v13  ;;  %vm511_vm4 = vcmask (!%p205_p10), 1039360   ;;  %vm556_vm5 = vcmask (!%p205_p10), 1031168   ;;  %vm594_vm6 = vcmask (!%p205_p10), 130048   ;;  %s793_s13 = sshll.u32 (!%p205_p10), %s948_s21, 7 }
  0x12   : > { %s1127_s24 = scalar_lea.hbm (!%p205_p10), %s1179_s5, %s793_s13 }
  0x13   : > { %v250_v18 = vadd.s32 (!%p205_p10), 256, %v248_v15  ;;  %vm255_vm3 = vcmp.ge.s32.totalorder (!%p205_p10), %v248_v15, 1 }
  0x15   : > { %271 = vperm.xlu0 (!%p205_p10), %870, %v244_v5   ;;  %484 = vperm.xlu1 (!%p205_p10), %871, %v244_v5   ;;  %vm260_vm2 = vcmp.le.s32.totalorder (!%p205_p10), %v250_v18, 256 }
  0x16   : > { %s233_s11 = scalar_select %p232_p11, %s948_s21, 1 }
  0x17   : > { %s966_s21 = smov [#allocation2]  }
  0x18   : > { %s806_s12 = smul.u32 12, %s233_s11  ;;  %s229_s11 = sand.u32 1, %s940_s19  }
  0x19   : > { %873 = vset.pattern.permute.xlu1 %v961_v10  ;;  %872 = vset.pattern.permute.xlu0 %v961_v10  ;;  %s687_s25 = scalar_lea.sflag [#allocation3], %s229_s11 }
  0x1a   : > { %s236_s17 = scalar_lea.vmem %s1174_s0, %s806_s12  ;;  %529 = vperm.xlu1 %873, %v244_v5   ;;  %525 = vperm.xlu0 %872, %v243_v2   ;;  %s778_s12 = sshll.u32 %s229_s11, 3 }
  0x1b   : > { %v1067_v6 = vld [vmem:[%s236_s17 + $0x8] sm:$0xf]  ;;  %v1069_v7 = vld [vmem:[%s236_s17] sm:$0xff]  ;;  %s231_s14 = scalar_lea.vmem [#allocation2], %s778_s12 }
  0x1c   : > { %797 = vmatprep.subr.msk.mxu1 %vm284_vm1, %v1067_v6  ;;  %v1077_v9 = vcombine.high %v1069_v7, %v1069_v7  ;;  %s703_s15 = sshll.u32 %s231_s14, 4  ;;  %s1129_s15 = int_to_ptr.vmem [resolvable:$true] %s703_s15 }
  0x1d   : > { %798 = vmatpush3.msk.msra.mxu1 %vm284_vm1, %v1067_v6 }
  0x1e   : > { %780 = vmatprep.subr.msk.mxu0 %vm284_vm1, %v1077_v9  ;;  %800 = vmatmul.mubr.msk.f32.vlgmr.msra.gmra.mrb[0].mxu1 %vm277_vm0, %v241_v8 }
  0x1f   : > { %781 = vmatpush1.msk.msra.mxu0 %vm284_vm1, %v1069_v7  ;;  %662 = vmatprep.mubr.f32.mxu1 %v958_v1 }
  0x20   : > { %782 = vmatmul.mubr.msk.f32.vlgmr.msra.gmra.mrb[0].mxu0 %vm277_vm0, %v240_v0  ;;  %874 = vset.pattern.permute.xlu1 %v962_v11 }
  0x21   : > { %361 = vmatprep.mubr.f32.mxu0 %v958_v1  ;;  %468 = vperm.xlu1 %874, %v243_v2  }
  0x22   : > { %875 = vset.pattern.permute.xlu0 %v962_v11 }
  0x23   : > { %472 = vperm.xlu0 %875, %v244_v5  }
  0x24   : > { %783 = vmatmul.mubr.msk.f32.gmra.mrb[2].mxu0 %vm277_vm0, %v241_v8 }
  0x25   : > { %876 = vset.pattern.permute.xlu1 %v963_v12 }
  0x26   : > { %570 = vperm.xlu1 %876, %v243_v2  }
  0x2a   : > { %574 = vperm.xlu1 %876, %v244_v5  }
  0x90   : > { %v267_v14 = vpop.permute.xlu0 %266  ;;  %v481_v16 = vpop.permute.xlu1 %480 }
  0x94   : > { %v272_v17 = vpop.permute.xlu0 %271  ;;  %v485_v29 = vpop.permute.xlu1 %484 }
  0x99   : > { %v530_v41 = vpop.permute.xlu1 %529  ;;  %v526_v50 = vpop.permute.xlu0 %525 }
  0xa0   : > { %v469_v63 = vpop.permute.xlu1 %468 }
  0xa2   : > { %v473_v2 = vpop.permute.xlu0 %472 }
  0xa5   : > { %v571_v0 = vpop.permute.xlu1 %570 }
  0xa9   : > { %v575_v1 = vpop.permute.xlu1 %574 }
  0xf1   : > { %v801_v19 = vpop.f32.mrb[0].mxu1 }
  0xf2   : > { %v440_v20 = vadd.f32 %v801_v19, %v272_v17  ;;  %v434_v21 = vpop.f32.mrb[1].mxu1 }
  0xf3   : > { %v435_v22 = vadd.f32 %v434_v21, %v267_v14  ;;  %v357_v23 = vpop.f32.mrb[0].mxu0 }
  0xf4   : > { %v448_v24 = vmax.f32 %v440_v20, 0.0  ;;  %v358_v25 = vadd.f32 %v357_v23, %v267_v14  ;;  %v359_v26 = vpop.f32.mrb[1].mxu0 }
  0xf5   : > { %v360_v27 = vadd.f32 %v359_v26, %v267_v14  ;;  %v445_v30 = vmax.f32 %v435_v22, 0.0 }
  0xf6   : > { %v454_v28 = vmin.f32 %v448_v24, 6.0  ;;  %v443_v31 = vmax.f32 %v358_v25, 0.0 }
  0xf7   : > { %v444_v32 = vmax.f32 %v360_v27, 0.0  ;;  %v363_v33 = vpop.f32.mrb[2].mxu0  ;;  %v451_v39 = vmin.f32 %v445_v30, 6.0 }
  0xf8   : > { %v466_v34 = vsel %vm260_vm2, %v454_v28, 0.0  ;;  %v365_v35 = vpop.f32.mrb[3].mxu0  ;;  %v449_v37 = vmin.f32 %v443_v31, 6.0  ;;  %v364_v40 = vadd.f32 %v363_v33, %v272_v17 }
  0xf9   : > { %v492_v36 = vmul.f32 %v485_v29, %v466_v34  ;;  %v450_v38 = vmin.f32 %v444_v32, 6.0  ;;  %v366_v42 = vadd.f32 %v365_v35, %v272_v17  ;;  %v537_v45 = vmul.f32 %v530_v41, %v466_v34 }
  0xfa   : > { %v1088_v44 = vsel %vm255_vm3, %v449_v37, 0.0  ;;  %v463_v46 = vsel %vm260_vm2, %v451_v39, 0.0  ;;  %v446_v47 = vmax.f32 %v364_v40, 0.0 }
  0xfb   : > { %509 = vrot.lane.b32.xlu1 %v492_v36, %s964_s27  ;;  %v488_v43 = vmul.f32 %v481_v16, %v450_v38  ;;  %v447_v48 = vmax.f32 %v366_v42, 0.0  ;;  %v487_v49 = vmul.f32 %v481_v16, %v1088_v44  ;;  %v489_v51 = vmul.f32 %v481_v16, %v463_v46 }
  0xfc   : > { %v452_v52 = vmin.f32 %v446_v47, 6.0  ;;  %v533_v54 = vmul.f32 %v526_v50, %v450_v38  ;;  %v534_v55 = vmul.f32 %v526_v50, %v463_v46  ;;  %v532_v61 = vmul.f32 %v526_v50, %v1088_v44 }
  0xfd   : > { %501 = vrot.lane.b32.xlu0 %v488_v43, %s964_s27  ;;  %v453_v53 = vmin.f32 %v447_v48, 6.0  ;;  %v475_v28 = vmul.f32 %v469_v63, %v1088_v44 }
  0xfe   : > { %v464_v56 = vsel %vm255_vm3, %v452_v52, 0.0 }
  0xff   : > { %554 = vrot.lane.b32.xlu1 %v537_v45, %s965_s29  ;;  %v491_v57 = vmul.f32 %v485_v29, %v453_v53  ;;  %v490_v58 = vmul.f32 %v485_v29, %v464_v56  ;;  %v536_v59 = vmul.f32 %v530_v41, %v453_v53  ;;  %v535_v60 = vmul.f32 %v530_v41, %v464_v56 }
 0x100   : > { %v478_v18 = vmul.f32 %v473_v2, %v453_v53  ;;  %v477_v20 = vmul.f32 %v473_v2, %v464_v56 }
 0x101   : > { %499 = vrot.lane.b32.xlu0 %v487_v49, %s964_s27  ;;  %v242_v49 = vld [vmem:[%s1177_s3] sm:$0xf] }
 0x103   : > { %503 = vrot.lane.b32.xlu1 %v489_v51, %s964_s27 }
 0x105   : > { %546 = vrot.lane.b32.xlu0 %v533_v54, %s965_s29 }
 0x107   : > { %548 = vrot.lane.b32.xlu1 %v534_v55, %s965_s29 }
 0x109   : > { %507 = vrot.lane.b32.xlu0 %v491_v57, %s964_s27 }
 0x10b   : > { %505 = vrot.lane.b32.xlu1 %v490_v58, %s964_s27 }
 0x10d   : > { %552 = vrot.lane.b32.xlu0 %v536_v59, %s965_s29 }
 0x10f   : > { %550 = vrot.lane.b32.xlu1 %v535_v60, %s965_s29 }
 0x111   : > { %544 = vrot.lane.b32.xlu0 %v532_v61, %s965_s29  ;;  %s882_s29 = sshll.u32 %s966_s21, 4  ;;  %s883_s29 = int_to_ptr.vmem [resolvable:$false] %s882_s29 }
 0x112   : > { %s884_s7 = scalar_lea.vmem %s883_s29, 256  ;;  %p885_p1 = scmp.lt.s32.totalorder %s1129_s15, %s883_s29 }
 0x113   : > { %669 = vrot.lane.b32.xlu1 %v1069_v7, %s964_s27  ;;  %v476_v7 = vmul.f32 %v469_v63, %v450_v38 }
 0x115   : > { %591 = vperm.xlu0 %875, %v245_v62  }
 0x117   : > { %673 = vrot.lane.b32.xlu1 %v1067_v6, %s964_s27 }
 0x119   : > { %671 = vrot.lane.b32.xlu0 %v1077_v9, %s964_s27  ;;  %s878_s27 = scalar_lea.vmem %s1129_s15, 128 }
 0x11a   : > { %p879_p12 = scmp.ne.s32.totalorder %s1129_s15, %s878_s27  ;;  %p886_p2 = scmp.lt.s32.totalorder %s884_s7, %s878_s27 }
 0x11c   : > { %p880_p13 = pnand %p879_p12, %p1037_p4  ;;  %p887_p3 = por %p886_p2, %p885_p1 }
 0x11e   : > { %p881_p0 = pneg %p880_p13 }
 0x120   : > { %p888_p5 = pnand %p887_p3, %p881_p0 }
 0x16d   : > { %v510_v3 = vpop.permute.xlu1 %509 }
 0x16f   : > { %v502_v4 = vpop.permute.xlu0 %501 }
 0x171   : > { %v555_v5 = vpop.permute.xlu1 %554 }
 0x173   : > { %v500_v8 = vpop.permute.xlu0 %499 }
 0x174   : > { %v512_v24 = vsel %vm511_vm4, %v500_v8, %v502_v4 }
 0x175   : > { %v504_v10 = vpop.permute.xlu1 %503  ;;  %v520_v32 = vadd.f32 %v512_v24, %v475_v28 }
 0x176   : > { %v513_v11 = vsel %vm511_vm4, %v502_v4, %v504_v10 }
 0x177   : > { %v547_v12 = vpop.permute.xlu0 %546  ;;  %v521_v6 = vadd.f32 %v513_v11, %v476_v7 }
 0x179   : > { %v549_v13 = vpop.permute.xlu1 %548 }
 0x17a   : > { %v558_v14 = vsel %vm556_vm5, %v547_v12, %v549_v13 }
 0x17b   : > { %v566_v9 = vadd.f32 %v558_v14, %v521_v6  ;;  %v508_v15 = vpop.permute.xlu0 %507 }
 0x17c   : > { %v515_v16 = vsel %vm511_vm4, %v508_v15, %v510_v3 }
 0x17d   : > { %v506_v17 = vpop.permute.xlu1 %505  ;;  %v578_v21 = vadd.f32 %v571_v0, %v566_v9  ;;  %v523_v22 = vadd.f32 %v515_v16, %v478_v18 }
 0x17e   : > { %v514_v19 = vsel %vm511_vm4, %v506_v17, %v508_v15 }
 0x17f   : > { %v553_v23 = vpop.permute.xlu0 %552  ;;  %v522_v25 = vadd.f32 %v514_v19, %v477_v20  ;;  %v582_v33 = vmax.f32 %v578_v21, 0.0 }
 0x180   : > { %v560_v26 = vsel %vm556_vm5, %v553_v23, %v555_v5 }
 0x181   : > { %v551_v27 = vpop.permute.xlu1 %550  ;;  %v568_v29 = vadd.f32 %v560_v26, %v523_v22  ;;  %v586_v40 = vmin.f32 %v582_v33, 6.0 }
 0x182   : > { %v559_v30 = vsel %vm556_vm5, %v551_v27, %v553_v23 }
 0x183   : > { %v567_v31 = vadd.f32 %v559_v30, %v522_v25  ;;  %v580_v34 = vadd.f32 %v575_v1, %v568_v29  ;;  %v545_v35 = vpop.permute.xlu0 %544 }
 0x184   : > { %v557_v37 = vsel %vm556_vm5, %v545_v35, %v547_v12 }
 0x185   : > { %v579_v36 = vadd.f32 %v575_v1, %v567_v31  ;;  %v584_v38 = vmax.f32 %v580_v34, 0.0  ;;  %v565_v39 = vadd.f32 %v557_v37, %v520_v32  ;;  %v670_v50 = vpop.permute.xlu1 %669 }
 0x187   : > { %v588_v41 = vmin.f32 %v584_v38, 6.0  ;;  %v583_v42 = vmax.f32 %v579_v36, 0.0  ;;  %v577_v43 = vadd.f32 %v571_v0, %v565_v39 }
 0x189   : > { %v581_v45 = vmax.f32 %v577_v43, 0.0  ;;  %v802_v44 = vpack.c.bf16 %v588_v41, %v586_v40  ;;  %v587_v46 = vmin.f32 %v583_v42, 6.0  ;;  %v674_v52 = vpop.permute.xlu1 %673 }
 0x18b   : > { %v585_v47 = vmin.f32 %v581_v45, 6.0  ;;  %803 = vmatprep.subr.bf16.mxu1 %v802_v44 }
 0x18d   : > { %v804_v48 = vpack.c.bf16 %v587_v46, %v585_v47 }
 0x18f   : > { %805 = vmatpush1.bf16.msra.mxu1 %v804_v48 }
 0x192   : > { %787 = vmatmul.mubr.msk.f32.vlgmr.msra.gmra.mrb[2].mxu1 %vm594_vm6, %v242_v49 }
 0x194   : > { %v592_v51 = vpop.permute.xlu0 %591 }
 0x198   : > { %v672_v53 = vpop.permute.xlu0 %671 }
 0x199   : > { %v676_v57 = vsel %vm511_vm4, %v672_v53, %v674_v52  ;;  %v675_v58 = vsel %vm511_vm4, %v670_v50, %v672_v53 }
 0x265   : > { %v664_v54 = vpop.f32.mrb[2].mxu1 }
 0x266   : > { %v665_v55 = vadd.f32 %v664_v54, %v592_v51  ;;  %v666_v56 = vpop.f32.mrb[3].mxu1 }
 0x267   : > { %v667_v59 = vadd.f32 %v666_v56, %v592_v51 }
 0x268   : > { %v679_v60 = vadd.f32 %v675_v58, %v665_v55 }
 0x269   : > { %v680_v61 = vadd.f32 %v676_v57, %v667_v59 }
 0x26b   : > { %v683_v62 = vcombine.low %v679_v60, %v680_v61 }
 0x26d   : > { %685 = vst [vmem:[%s231_s14] sm:$0xff] %v683_v62 }
 0x26e   : > { %891 = shalt.err (!%p888_p5)
}
 0x26f   : > { %s892_s8 = scalar_lea.hbm %s1127_s24, 128  ;;  %s896_s11 = scalar_lea.hbm %s1179_s5, 256 }
 0x270   : > { %p893_p6 = scmp.ne.s32.totalorder %s1127_s24, %s892_s8  ;;  %p897_p10 = scmp.lt.u32.totalorder %s1127_s24, %s1179_s5 }
 0x271   : > { %p898_p11 = scmp.lt.u32.totalorder %s896_s11, %s892_s8  ;;  %p900_p13 = scmp.lt.u32.totalorder %s892_s8, %s1127_s24 }
 0x272   : > { %p894_p7 = pnand %p893_p6, %p1037_p4 }
 0x273   : > { %p899_p12 = por %p898_p11, %p897_p10 }
 0x274   : > { %p895_p9 = pneg %p894_p7 }
 0x275   : > { %p901_p0 = por %p900_p13, %p899_p12 }
 0x277   : > { %p902_p1 = pnand %p901_p0, %p895_p9 }
 0x279   : > { %905 = shalt.err (!%p902_p1)
}
 0x27a   : > { %807 = dma.vmem_to_hbm [thread:$0]  (%p1037_p4), %s1129_s15, 128, %s1127_s24, %s687_s25  }
 0x27b PF: > { %p813_p2 = scmp.ge.s32.totalorder %s956_s23, 2  ;;  %s715_s14 = sand.u32 1, %s936_s18  }
 0x27c   : > { %s716_s16 = scalar_lea.sflag [#allocation3], %s715_s14 }
 0x27d   : > { %p810_p3 = pnand %p813_p2, %p1044_p8 }
 0x27f   : > { %931 = dma.done.wait (!%p810_p3), %s716_s16, 128  }
 0x280   : > { %933 = vsyncadd (!%p810_p3), %s716_s16, 4294967168  ;;  %s18_s23 = sadd.s32 1, %s956_s23   ;;  %s1182_s18 = smov %s940_s19 }
 0x281   : > { %p15_p5 = scmp.ge.s32.totalorder %s18_s23, 4   ;;  %s1183_s19 = smov %s944_s20 }
 0x282   : > { %s1184_s20 = smov %s1050_s6  ;;  %s1185_s21 = smov %s952_s22 }
 0x283   : > { %s1186_s22 = smov %s1188_s26  ;;  %17 = sbr.rel (!%p15_p5) target bundleno = 4 (0x4), region = 75 }
 0x28a   :  { %721 = vsyncpa [#allocation3], 1 }
 0x28b   :  { %723 = vsyncpa [#allocation3 + $0x1], 1 }

</bundles_post_ra>
